<compile_context>
chip_gen: v6e
topology: v6e:2x2x1
jax: 0.10.0
libtpu: 0.0.40
codegen_flags: <defaults>
</compile_context>

<pallas_src>
import jax
import jax.numpy as jnp
from jax import lax
from jax.experimental import pallas as pl
from jax.experimental.pallas import tpu as pltpu


def _embbag_fc_kernel(tok_ref, starts_ref, ends_ref, emb_ref, wt_ref, bias_ref,
                      out_ref, bag_ref, acc_ref):
    """Fused EmbeddingBag(mean) + Linear, streamed over vocab tiles."""
    k = pl.program_id(0)
    nk = pl.num_programs(0)
    Npad = tok_ref.shape[0]
    Vt = emb_ref.shape[0]          # vocab tile size (lane-dense)
    Bpad = out_ref.shape[0]

    # ---- per-bag mean matrix (Bpad, Npad): 1/count inside [start, end), else 0.
    #      Computed once and cached in VMEM scratch (grid-resident).
    @pl.when(k == 0)
    def _():
        starts = starts_ref[...]                                     # (Bpad, 1) int32
        ends = ends_ref[...]                                         # (Bpad, 1) int32
        t_iota = lax.broadcasted_iota(jnp.int32, (Bpad, Npad), 1)
        in_bag = (t_iota >= starts) & (t_iota < ends)
        count = jnp.maximum(ends - starts, 1).astype(jnp.float32)    # empty bag -> zeros
        bag_ref[...] = jnp.where(in_bag, 1.0 / count, 0.0)
        acc_ref[...] = jnp.zeros_like(acc_ref)

    # ---- one-hot of the tokens against this vocab tile.
    #      Padding tokens are -1 and never match any vocab id.
    local = tok_ref[...] - k * Vt                                     # (Npad, 1) int32
    v_iota = lax.broadcasted_iota(jnp.int32, (Npad, Vt), 1)
    onehot = (v_iota == local).astype(jnp.float32)                    # (Npad, Vt)

    # ---- bag-of-words mean for this tile, then stream the table tile via MXU.
    bow = jnp.dot(bag_ref[...], onehot,
                  preferred_element_type=jnp.float32)                 # (Bpad, Vt)
    acc_ref[...] += jnp.dot(bow, emb_ref[...].astype(jnp.float32),
                            preferred_element_type=jnp.float32)       # (Bpad, Dpad)

    # ---- FC on the last vocab tile: out = pooled @ W^T + bias (lane-dense store).
    @pl.when(k == nk - 1)
    def _():
        out_ref[...] = (
            jnp.dot(acc_ref[...], wt_ref[...], preferred_element_type=jnp.float32)
            + bias_ref[...]
        )


def _round_up(x, m):
    return ((x + m - 1) // m) * m


def text_classification_forward(text, offsets, emb_table, fc_w, fc_b):
    """text: (ntok,) int token ids; offsets: (batch,) int bag start indices.

    Returns logits (batch, num_label) == FC(EmbeddingBag(text, offsets, mode='mean')).
    """
    ntok = text.shape[0]
    B = offsets.shape[0]
    V, D = emb_table.shape
    L = fc_w.shape[0]

    # Lane/sublane-dense padded sizes.
    Npad = max(_round_up(ntok, 128), 128)
    Dpad = max(_round_up(D, 128), 128)
    Lpad = max(_round_up(L, 128), 128)
    Bpad = max(_round_up(B, 8), 8)

    # Vocab tiling: stream the table in lane-dense tiles so huge tables fit VMEM.
    Vpad128 = max(_round_up(V, 128), 128)
    VTILE = min(Vpad128, 512)
    Vpad = _round_up(Vpad128, VTILE)
    n_vtiles = Vpad // VTILE

    # Tokens as a (Npad, 1) column; pad with -1 so padded rows never match any vocab id.
    tok_p = jnp.full((Npad, 1), -1, jnp.int32).at[:ntok, 0].set(text.astype(jnp.int32))

    # Bag ranges [starts, ends); padded bags are empty (0, 0) -> zero output rows.
    offsets_i = offsets.astype(jnp.int32)
    ends_i = jnp.concatenate([offsets_i[1:], jnp.array([ntok], jnp.int32)])
    starts_p = jnp.zeros((Bpad, 1), jnp.int32).at[:B, 0].set(offsets_i)
    ends_p = jnp.zeros((Bpad, 1), jnp.int32).at[:B, 0].set(ends_i)

    # Embedding table in its storage dtype (cast happens in-kernel, per tile).
    emb_p = jnp.zeros((Vpad, Dpad), emb_table.dtype).at[:V, :D].set(emb_table)
    # FC weight pre-transposed and zero-padded; bias zero-padded.
    wt_p = jnp.zeros((Dpad, Lpad), jnp.float32).at[:D, :L].set(fc_w.T.astype(jnp.float32))
    bias_p = jnp.zeros((1, Lpad), jnp.float32).at[0, :L].set(fc_b.astype(jnp.float32))

    # Scoped-VMEM budget: double-buffered streamed tile + resident operands + scratch.
    def _nbytes(shape, dtype):
        return int(jnp.dtype(dtype).itemsize) * int(jnp.prod(jnp.array(shape)))
    needed = (2 * _nbytes((VTILE, Dpad), emb_table.dtype)          # double-buffered table tile
              + _nbytes((Npad, 1), jnp.int32)
              + 2 * _nbytes((Bpad, 1), jnp.int32)
              + _nbytes((Dpad, Lpad), jnp.float32)
              + _nbytes((1, Lpad), jnp.float32)
              + _nbytes((Bpad, Lpad), jnp.float32)                 # output block
              + _nbytes((Bpad, Npad), jnp.float32)                 # bag_mat scratch
              + _nbytes((Bpad, Dpad), jnp.float32)                 # pooled accumulator
              + (4 << 20))                                         # headroom
    vmem_limit = int(min(96 << 20, max(8 << 20, needed)))

    out = pl.pallas_call(
        _embbag_fc_kernel,
        out_shape=jax.ShapeDtypeStruct((Bpad, Lpad), jnp.float32),
        grid_spec=pltpu.PrefetchScalarGridSpec(
            num_scalar_prefetch=0,
            grid=(n_vtiles,),
            in_specs=[
                pl.BlockSpec((Npad, 1), lambda k: (0, 0)),          # token ids
                pl.BlockSpec((Bpad, 1), lambda k: (0, 0)),          # bag starts
                pl.BlockSpec((Bpad, 1), lambda k: (0, 0)),          # bag ends
                pl.BlockSpec((VTILE, Dpad), lambda k: (k, 0)),      # streamed table tile
                pl.BlockSpec((Dpad, Lpad), lambda k: (0, 0)),       # FC weight^T
                pl.BlockSpec((1, Lpad), lambda k: (0, 0)),          # FC bias
            ],
            out_specs=pl.BlockSpec((Bpad, Lpad), lambda k: (0, 0)),
            scratch_shapes=[
                pltpu.VMEM((Bpad, Npad), jnp.float32),              # cached bag-mean matrix
                pltpu.VMEM((Bpad, Dpad), jnp.float32),              # pooled accumulator
            ],
        ),
        compiler_params=pltpu.CompilerParams(
            dimension_semantics=("arbitrary",),                     # vocab axis is a reduction
            vmem_limit_bytes=vmem_limit,
        ),
    )(tok_p, starts_p, ends_p, emb_p, wt_p, bias_p)

    return out[:B, :L]


def _reference_forward(text, offsets, emb_table, fc_w, fc_b):
    """Pure-JAX reference mirroring nn.EmbeddingBag(mean) + nn.Linear."""
    ntok = text.shape[0]
    off_ext = list(offsets.tolist()) + [ntok]
    rows = []
    for i in range(offsets.shape[0]):
        s, e = int(off_ext[i]), int(off_ext[i + 1])
        if e > s:
            rows.append(emb_table[text[s:e]].astype(jnp.float32).mean(axis=0))
        else:
            rows.append(jnp.zeros((emb_table.shape[1],), jnp.float32))
    pooled = jnp.stack(rows)
    return pooled @ fc_w.T.astype(jnp.float32) + fc_b.astype(jnp.float32)


if __name__ == "__main__":
    # Model hyper-params (small, consistent with the module's __init__ shapes).
    vocab_size, emb_dim, num_label = 64, 32, 8
    batch = 4
    ntok = 18

    key = jax.random.PRNGKey(0)
    k_emb, k_w, k_text = jax.random.split(key, 3)

    # Deterministic init matching init_weights(): uniform(-0.5, 0.5), bias = 0.
    initrange = 0.5
    emb_table = jax.random.uniform(
        k_emb, (vocab_size, emb_dim), jnp.float32, -initrange, initrange)
    fc_w = jax.random.uniform(
        k_w, (num_label, emb_dim), jnp.float32, -initrange, initrange)
    fc_b = jnp.zeros((num_label,), jnp.float32)

    # Synthetic "batch of concatenated token sequences" + bag offsets.
    text = jax.random.randint(k_text, (ntok,), 0, vocab_size, dtype=jnp.int32)
    offsets = jnp.array([0, 3, 7, 12], dtype=jnp.int32)   # bags of len 3, 4, 5, 6

    out = text_classification_forward(text, offsets, emb_table, fc_w, fc_b)
    out = jax.block_until_ready(out)

    ref = _reference_forward(text, offsets, emb_table, fc_w, fc_b)
    assert out.shape == (batch, num_label), out.shape
    assert jnp.allclose(out, ref, atol=1e-5, rtol=1e-5), (out, ref)

    print("KERNEL_OK")
</pallas_src>

<mosaic_0001>
module attributes {stable_mosaic.version = 11 : i64} {
  func.func @_embbag_fc_kernel(%arg0: i32, %arg1: memref<128x1xi32, #tpu.memory_space<vmem>>, %arg2: memref<8x1xi32, #tpu.memory_space<vmem>>, %arg3: memref<8x1xi32, #tpu.memory_space<vmem>>, %arg4: memref<128x128xf32, #tpu.memory_space<vmem>>, %arg5: memref<128x128xf32, #tpu.memory_space<vmem>>, %arg6: memref<1x128xf32, #tpu.memory_space<vmem>>, %arg7: memref<8x128xf32, #tpu.memory_space<vmem>>, %arg8: memref<8x128xf32, #tpu.memory_space<vmem>>, %arg9: memref<8x128xf32, #tpu.memory_space<vmem>>) attributes {dimension_semantics = [#tpu.dimension_semantics<arbitrary>], iteration_bounds = array<i64: 1>, scalar_prefetch = 0 : i64, scratch_operands = 2 : i64, tpu.core_type = #tpu.core_type<tc>, window_params = [{pipeline_mode = #tpu.pipeline_mode<synchronous>, transform_indices = @transform_0, window_bounds = array<i64: 128, 1>}, {pipeline_mode = #tpu.pipeline_mode<synchronous>, transform_indices = @transform_1, window_bounds = array<i64: 8, 1>}, {pipeline_mode = #tpu.pipeline_mode<synchronous>, transform_indices = @transform_2, window_bounds = array<i64: 8, 1>}, {transform_indices = @transform_3, window_bounds = array<i64: 128, 128>}, {pipeline_mode = #tpu.pipeline_mode<synchronous>, transform_indices = @transform_4, window_bounds = array<i64: 128, 128>}, {pipeline_mode = #tpu.pipeline_mode<synchronous>, transform_indices = @transform_5, window_bounds = array<i64: 1, 128>}, {pipeline_mode = #tpu.pipeline_mode<synchronous>, transform_indices = @transform_6, window_bounds = array<i64: 8, 128>}]} {
    %c0_i32 = arith.constant 0 : i32
    %0 = arith.cmpi eq, %arg0, %c0_i32 : i32
    %1 = arith.extui %0 : i1 to i32
    %c0_i32_0 = arith.constant 0 : i32
    %2 = arith.cmpi ne, %1, %c0_i32_0 : i32
    scf.if %2 {
      %c0_13 = arith.constant 0 : index
      %c0_14 = arith.constant 0 : index
      %22 = vector.load %arg2[%c0_13, %c0_14] : memref<8x1xi32, #tpu.memory_space<vmem>>, vector<8x1xi32>
      %c0_15 = arith.constant 0 : index
      %c0_16 = arith.constant 0 : index
      %23 = vector.load %arg3[%c0_15, %c0_16] : memref<8x1xi32, #tpu.memory_space<vmem>>, vector<8x1xi32>
      %24 = tpu.iota {dimensions = array<i32: 1>} : vector<8x128xi32>
      %25 = vector.broadcast %22 : vector<8x1xi32> to vector<8x128xi32>
      %26 = arith.cmpi sge, %24, %25 : vector<8x128xi32>
      %27 = vector.broadcast %23 : vector<8x1xi32> to vector<8x128xi32>
      %28 = arith.cmpi slt, %24, %27 : vector<8x128xi32>
      %29 = arith.andi %26, %28 : vector<8x128xi1>
      %30 = arith.subi %23, %22 : vector<8x1xi32>
      %c1_i32 = arith.constant 1 : i32
      %31 = vector.broadcast %c1_i32 : i32 to vector<8x1xi32>
      %32 = arith.maxsi %30, %31 : vector<8x1xi32>
      %33 = arith.sitofp %32 : vector<8x1xi32> to vector<8x1xf32>
      %cst_17 = arith.constant 1.000000e+00 : f32
      %34 = vector.broadcast %cst_17 : f32 to vector<8x1xf32>
      %35 = arith.divf %34, %33 : vector<8x1xf32>
      %cst_18 = arith.constant 0.000000e+00 : f32
      %36 = vector.shape_cast %35 : vector<8x1xf32> to vector<8x1xf32>
      %37 = vector.broadcast %36 : vector<8x1xf32> to vector<8x128xf32>
      %38 = vector.broadcast %cst_18 : f32 to vector<8x128xf32>
      %39 = arith.select %29, %37, %38 : vector<8x128xi1>, vector<8x128xf32>
      %c0_19 = arith.constant 0 : index
      %c0_20 = arith.constant 0 : index
      %40 = vector.load %arg8[%c0_19, %c0_20] : memref<8x128xf32, #tpu.memory_space<vmem>>, vector<8x128xf32>
      tpu.vector_store %arg8[%c0_19, %c0_20], %39 {strides = array<i32>} : memref<8x128xf32, #tpu.memory_space<vmem>>, vector<8x128xf32>,
      %cst_21 = arith.constant 0.000000e+00 : f32
      %41 = vector.broadcast %cst_21 : f32 to vector<8x128xf32>
      %c0_22 = arith.constant 0 : index
      %c0_23 = arith.constant 0 : index
      %42 = vector.load %arg9[%c0_22, %c0_23] : memref<8x128xf32, #tpu.memory_space<vmem>>, vector<8x128xf32>
      tpu.vector_store %arg9[%c0_22, %c0_23], %41 {strides = array<i32>} : memref<8x128xf32, #tpu.memory_space<vmem>>, vector<8x128xf32>,
    } else {
    }
    %c0 = arith.constant 0 : index
    %c0_1 = arith.constant 0 : index
    %3 = vector.load %arg1[%c0, %c0_1] : memref<128x1xi32, #tpu.memory_space<vmem>>, vector<128x1xi32>
    %c128_i32 = arith.constant 128 : i32
    %4 = arith.muli %arg0, %c128_i32 : i32
    %5 = vector.broadcast %4 : i32 to vector<128x1xi32>
    %6 = arith.subi %3, %5 : vector<128x1xi32>
    %7 = tpu.iota {dimensions = array<i32: 1>} : vector<128x128xi32>
    %8 = vector.broadcast %6 : vector<128x1xi32> to vector<128x128xi32>
    %9 = arith.cmpi eq, %7, %8 : vector<128x128xi32>
    %10 = arith.extui %9 : vector<128x128xi1> to vector<128x128xi32>
    %11 = arith.sitofp %10 : vector<128x128xi32> to vector<128x128xf32>
    %c0_2 = arith.constant 0 : index
    %c0_3 = arith.constant 0 : index
    %12 = vector.load %arg8[%c0_2, %c0_3] : memref<8x128xf32, #tpu.memory_space<vmem>>, vector<8x128xf32>
    %cst = arith.constant dense<0.000000e+00> : vector<8x128xf32>
    %13 = tpu.matmul %12, %11, %cst {dimension_numbers = #tpu.dot_dimension_numbers<[1], [0], [0], [1], [0, 0, 1, 1], [], []>} : vector<8x128xf32>, vector<128x128xf32>, vector<8x128xf32> -> vector<8x128xf32>
    %c0_4 = arith.constant 0 : index
    %c0_5 = arith.constant 0 : index
    %14 = vector.load %arg9[%c0_4, %c0_5] : memref<8x128xf32, #tpu.memory_space<vmem>>, vector<8x128xf32>
    %c0_6 = arith.constant 0 : index
    %c0_7 = arith.constant 0 : index
    %15 = vector.load %arg4[%c0_6, %c0_7] : memref<128x128xf32, #tpu.memory_space<vmem>>, vector<128x128xf32>
    %cst_8 = arith.constant dense<0.000000e+00> : vector<8x128xf32>
    %16 = tpu.matmul %13, %15, %cst_8 {dimension_numbers = #tpu.dot_dimension_numbers<[1], [0], [0], [1], [0, 0, 1, 1], [], []>} : vector<8x128xf32>, vector<128x128xf32>, vector<8x128xf32> -> vector<8x128xf32>
    %17 = arith.addf %14, %16 : vector<8x128xf32>
    %c0_9 = arith.constant 0 : index
    %c0_10 = arith.constant 0 : index
    %18 = vector.load %arg9[%c0_9, %c0_10] : memref<8x128xf32, #tpu.memory_space<vmem>>, vector<8x128xf32>
    tpu.vector_store %arg9[%c0_9, %c0_10], %17 {strides = array<i32>} : memref<8x128xf32, #tpu.memory_space<vmem>>, vector<8x128xf32>,
    %c0_i32_11 = arith.constant 0 : i32
    %19 = arith.cmpi eq, %arg0, %c0_i32_11 : i32
    %20 = arith.extui %19 : i1 to i32
    %c0_i32_12 = arith.constant 0 : i32
    %21 = arith.cmpi ne, %20, %c0_i32_12 : i32
    scf.if %21 {
      %c0_13 = arith.constant 0 : index
      %c0_14 = arith.constant 0 : index
      %22 = vector.load %arg9[%c0_13, %c0_14] : memref<8x128xf32, #tpu.memory_space<vmem>>, vector<8x128xf32>
      %c0_15 = arith.constant 0 : index
      %c0_16 = arith.constant 0 : index
      %23 = vector.load %arg5[%c0_15, %c0_16] : memref<128x128xf32, #tpu.memory_space<vmem>>, vector<128x128xf32>
      %cst_17 = arith.constant dense<0.000000e+00> : vector<8x128xf32>
      %24 = tpu.matmul %22, %23, %cst_17 {dimension_numbers = #tpu.dot_dimension_numbers<[1], [0], [0], [1], [0, 0, 1, 1], [], []>} : vector<8x128xf32>, vector<128x128xf32>, vector<8x128xf32> -> vector<8x128xf32>
      %c0_18 = arith.constant 0 : index
      %c0_19 = arith.constant 0 : index
      %25 = vector.load %arg6[%c0_18, %c0_19] : memref<1x128xf32, #tpu.memory_space<vmem>>, vector<1x128xf32>
      %26 = vector.broadcast %25 : vector<1x128xf32> to vector<8x128xf32>
      %27 = arith.addf %24, %26 : vector<8x128xf32>
      %c0_20 = arith.constant 0 : index
      %c0_21 = arith.constant 0 : index
      %28 = vector.load %arg7[%c0_20, %c0_21] : memref<8x128xf32, #tpu.memory_space<vmem>>, vector<8x128xf32>
      tpu.vector_store %arg7[%c0_20, %c0_21], %27 {strides = array<i32>} : memref<8x128xf32, #tpu.memory_space<vmem>>, vector<8x128xf32>,
    } else {
    }
    return
  }
  func.func @transform_0(%arg0: i32) -> (i32, i32) {
    %c0_i32 = arith.constant 0 : i32
    %c0_i32_0 = arith.constant 0 : i32
    %c0_i32_1 = arith.constant 0 : i32
    return %c0_i32, %c0_i32_0 : i32, i32
  }
  func.func @transform_1(%arg0: i32) -> (i32, i32) {
    %c0_i32 = arith.constant 0 : i32
    %c0_i32_0 = arith.constant 0 : i32
    %c0_i32_1 = arith.constant 0 : i32
    return %c0_i32, %c0_i32_0 : i32, i32
  }
  func.func @transform_2(%arg0: i32) -> (i32, i32) {
    %c0_i32 = arith.constant 0 : i32
    %c0_i32_0 = arith.constant 0 : i32
    %c0_i32_1 = arith.constant 0 : i32
    return %c0_i32, %c0_i32_0 : i32, i32
  }
  func.func @transform_3(%arg0: i32) -> (i32, i32) {
    %c0_i32 = arith.constant 0 : i32
    %c0_i32_0 = arith.constant 0 : i32
    return %arg0, %c0_i32 : i32, i32
  }
  func.func @transform_4(%arg0: i32) -> (i32, i32) {
    %c0_i32 = arith.constant 0 : i32
    %c0_i32_0 = arith.constant 0 : i32
    %c0_i32_1 = arith.constant 0 : i32
    return %c0_i32, %c0_i32_0 : i32, i32
  }
  func.func @transform_5(%arg0: i32) -> (i32, i32) {
    %c0_i32 = arith.constant 0 : i32
    %c0_i32_0 = arith.constant 0 : i32
    %c0_i32_1 = arith.constant 0 : i32
    return %c0_i32, %c0_i32_0 : i32, i32
  }
  func.func @transform_6(%arg0: i32) -> (i32, i32) {
    %c0_i32 = arith.constant 0 : i32
    %c0_i32_0 = arith.constant 0 : i32
    %c0_i32_1 = arith.constant 0 : i32
    return %c0_i32, %c0_i32_0 : i32, i32
  }
}

</mosaic_0001>

<bundles_post_ra>
// kernel: tpu_custom_call.1
= control target key start
LH: loop header
LB: loop body
LE: loop exit
PB: predicated region body
PF: predicated region fallthrough
CT: control target
= control target key end

     0   :  { %11 = vsyncpa [#allocation5], 0  ;;  %s964_s0 = inlined_call_operand.vmem [shape: s32[128,1], index: 0, kind: input, shape index: {}]   ;;  %s965_s1 = inlined_call_operand.vmem [shape: s32[8,1], index: 1, kind: input, shape index: {}]   ;;  %s966_s2 = inlined_call_operand.vmem [shape: s32[8,1], index: 2, kind: input, shape index: {}]   ;;  %s967_s3 = inlined_call_operand.vmem [shape: f32[128,128], index: 3, kind: input, shape index: {}]   ;;  %s968_s4 = inlined_call_operand.hbm [shape: f32[128,128], index: 4, kind: input, shape index: {}]   ;;  %s969_s5 = inlined_call_operand.vmem [shape: f32[1,128], index: 5, kind: input, shape index: {}]   ;;  %s970_s6 = inlined_call_operand.hbm [shape: f32[8,128], index: 6, kind: output, shape index: {}]  }
   0x1   :  { %12 = vsyncpa [#allocation6], 0  ;;  %s720_s21 = smov [#allocation4]  }
   0x2   :  { %s26_s22 = sshll.u32 %s720_s21, 4  ;;  %s27_s22 = int_to_ptr.vmem [resolvable:$true] %s26_s22 }
   0x3   :  { %s684_s23 = scalar_lea.vmem %s27_s22, 2048  ;;  %p689_p1 = scmp.lt.s32.totalorder %s27_s22, %s27_s22 }
   0x4   :  { %p685_p0 = scmp.ne.s32.totalorder %s27_s22, %s684_s23  ;;  %p690_p2 = scmp.lt.s32.totalorder %s684_s23, %s684_s23 }
   0x6   :  { %p691_p3 = por %p690_p2, %p689_p1 }
   0x8   :  { %p692_p4 = pnand %p691_p3, %p685_p0 }
   0xa   :  { %695 = shalt.err (!%p692_p4)
}
   0xb   :  { %s721_s24 = smov 128   ;;  %s722_s25 = smov 8  }
   0xc   :  { %32 = dma.hbm_to_vmem [thread:$0]  %s968_s4, 2048, %s27_s22, [#allocation5], %s721_s24, %s721_s24, %s722_s25  }
   0xd   :  { %716 = dma.done.wait [#allocation5], 2048  }
   0xe   :  { %717 = vsyncadd [#allocation5], 4294965248  ;;  %v723_v0 = vmov 0   ;;  %v724_v1 = vmov 0.0   ;;  %v84_v2 = vld [vmem:[%s964_s0 + $0x78] sm:$0xff]  ;;  %v82_v3 = vld [vmem:[%s964_s0 + $0x68] sm:$0xff]  ;;  %v44_v39 = vlaneseq }
   0xf   :  { %673 = vset.pattern.permute.xlu1 %v723_v0  ;;  %672 = vset.pattern.permute.xlu0 %v723_v0  ;;  %v83_v4 = vld [vmem:[%s964_s0 + $0x70] sm:$0xff]  ;;  %v81_v5 = vld [vmem:[%s964_s0 + $0x60] sm:$0xff]  ;;  %v80_v8 = vld [vmem:[%s964_s0 + $0x58] sm:$0xff]  ;;  %vm725_vm1 = vmmov 0   ;;  %v726_v43 = vmov 1.0   ;;  %s727_s16 = smov [#allocation7]  }
  0x10   :  { %559 = vmatprep.subr.mxu0 %v724_v1  ;;  %594 = vmatprep.subr.mxu1 %v724_v1  ;;  %v42_v6 = vld [vmem:[%s965_s1] sm:$0xff]  ;;  %v79_v9 = vld [vmem:[%s964_s0 + $0x50] sm:$0xff]  ;;  %v78_v11 = vld [vmem:[%s964_s0 + $0x48] sm:$0xff]  ;;  %v886_v40 = vand.u32 127, %v44_v39  ;;  %s465_s17 = sshll.u32 %s727_s16, 4  ;;  %s466_s17 = int_to_ptr.vmem [resolvable:$true] %s465_s17 }
  0x11   :  { %151 = vperm.xlu0 %672, %v84_v2   ;;  %145 = vperm.xlu1 %673, %v82_v3   ;;  %v43_v7 = vld [vmem:[%s966_s2] sm:$0xff]  ;;  %v76_v13 = vld [vmem:[%s964_s0 + $0x38] sm:$0xff]  ;;  %v75_v14 = vld [vmem:[%s964_s0 + $0x30] sm:$0xff]  ;;  %s696_s18 = scalar_lea.vmem %s466_s17, 128  ;;  %p701_p6 = scmp.lt.s32.totalorder %s466_s17, %s466_s17 }
  0x12   :  { %v55_v10 = vsub.s32 %v43_v7, %v42_v6  ;;  %v77_v12 = vld [vmem:[%s964_s0 + $0x40] sm:$0xff]  ;;  %v74_v17 = vld [vmem:[%s964_s0 + $0x28] sm:$0xff]  ;;  %v72_v19 = vld [vmem:[%s964_s0 + $0x18] sm:$0xff]  ;;  %591 = vmatprep.mubr.msk.f32.mxu0 %vm725_vm1, %v724_v1  ;;  %626 = vmatprep.mubr.msk.f32.mxu1 %vm725_vm1, %v724_v1  ;;  %p697_p5 = scmp.ne.s32.totalorder %s466_s17, %s696_s18  ;;  %p702_p7 = scmp.lt.s32.totalorder %s696_s18, %s696_s18 }
  0x13   :  { %v73_v18 = vld [vmem:[%s964_s0 + $0x20] sm:$0xff]  ;;  %v71_v20 = vld [vmem:[%s964_s0 + $0x10] sm:$0xff]  ;;  %v70_v21 = vld [vmem:[%s964_s0 + $0x8] sm:$0xff] }
  0x14   :  { %vm56_vm0 = vcmp.gt.s32.totalorder %v55_v10, 1  ;;  %v69_v22 = vld [vmem:[%s964_s0] sm:$0xff]  ;;  %v288_v23 = vld [vmem:[%s967_s3 + $0x78] sm:$0xff]  ;;  %v287_v24 = vld [vmem:[%s967_s3 + $0x70] sm:$0xff]  ;;  %p703_p8 = por %p702_p7, %p701_p6 }
  0x15   :  { %148 = vperm.xlu0 %672, %v83_v4   ;;  %142 = vperm.xlu1 %673, %v81_v5   ;;  %v57_v15 = vsel %vm56_vm0, %v55_v10, 1  ;;  %v286_v26 = vld [vmem:[%s967_s3 + $0x68] sm:$0xff]  ;;  %v285_v27 = vld [vmem:[%s967_s3 + $0x60] sm:$0xff]  ;;  %v284_v28 = vld [vmem:[%s967_s3 + $0x58] sm:$0xff] }
  0x16   :  { %v58_v16 = vcvt.s32.f32 %v57_v15  ;;  %595 = vmatpush3.msra.mxu1 %v288_v23  ;;  %v283_v29 = vld [vmem:[%s967_s3 + $0x50] sm:$0xff]  ;;  %v282_v30 = vld [vmem:[%s967_s3 + $0x48] sm:$0xff]  ;;  %v281_v31 = vld [vmem:[%s967_s3 + $0x40] sm:$0xff]  ;;  %p704_p9 = pnand %p703_p8, %p697_p5 }
  0x17   :  { %596 = vmatprep.subr.mxu1 %v724_v1  ;;  %v280_v32 = vld [vmem:[%s967_s3 + $0x38] sm:$0xff]  ;;  %v279_v33 = vld [vmem:[%s967_s3 + $0x30] sm:$0xff]  ;;  %v278_v34 = vld [vmem:[%s967_s3 + $0x28] sm:$0xff] }
  0x18   :  { %674 = vrcp.f32 %v58_v16  ;;  %597 = vmatpush3.msra.mxu1 %v287_v24  ;;  %v277_v35 = vld [vmem:[%s967_s3 + $0x20] sm:$0xff]  ;;  %v276_v36 = vld [vmem:[%s967_s3 + $0x18] sm:$0xff]  ;;  %v275_v37 = vld [vmem:[%s967_s3 + $0x10] sm:$0xff] }
  0x19   :  { %139 = vperm.xlu0 %672, %v80_v8   ;;  %136 = vperm.xlu1 %673, %v79_v9   ;;  %v274_v38 = vld [vmem:[%s967_s3 + $0x8] sm:$0xff]  ;;  %v273_v61 = vld [vmem:[%s967_s3] sm:$0xff]  ;;  %v380_v62 = vld [vmem:[#allocation4 + $0x78] sm:$0xff] }
  0x1a   :  { %598 = vmatprep.subr.mxu1 %v724_v1  ;;  %v379_v63 = vld [vmem:[#allocation4 + $0x70] sm:$0xff]  ;;  %v378_v0 = vld [vmem:[#allocation4 + $0x68] sm:$0xff]  ;;  %v377_v2 = vld [vmem:[#allocation4 + $0x60] sm:$0xff] }
  0x1b   :  { %599 = vmatpush3.msra.mxu1 %v286_v26  ;;  %v376_v3 = vld [vmem:[#allocation4 + $0x58] sm:$0xff]  ;;  %v375_v4 = vld [vmem:[#allocation4 + $0x50] sm:$0xff]  ;;  %v374_v5 = vld [vmem:[#allocation4 + $0x48] sm:$0xff] }
  0x1c   :  { %600 = vmatprep.subr.mxu1 %v724_v1  ;;  %v371_v8 = vld [vmem:[#allocation4 + $0x30] sm:$0xff]  ;;  %v370_v9 = vld [vmem:[#allocation4 + $0x28] sm:$0xff]  ;;  %v369_v10 = vld [vmem:[#allocation4 + $0x20] sm:$0xff] }
  0x1d   :  { %133 = vperm.xlu0 %672, %v78_v11   ;;  %130 = vperm.xlu1 %673, %v77_v12   ;;  %v368_v11 = vld [vmem:[#allocation4 + $0x18] sm:$0xff]  ;;  %v367_v12 = vld [vmem:[#allocation4 + $0x10] sm:$0xff]  ;;  %v365_v16 = vld [vmem:[#allocation4] sm:$0xff] }
  0x1e   :  { %601 = vmatpush3.msra.mxu1 %v285_v27 }
  0x1f   :  { %602 = vmatprep.subr.mxu1 %v724_v1 }
  0x20   :  { %603 = vmatpush3.msra.mxu1 %v284_v28 }
  0x21   :  { %127 = vperm.xlu0 %672, %v76_v13   ;;  %124 = vperm.xlu1 %673, %v75_v14   ;;  %v366_v13 = vld [vmem:[#allocation4 + $0x8] sm:$0xff] }
  0x22   :  { %604 = vmatprep.subr.mxu1 %v724_v1 }
  0x23   :  { %605 = vmatpush3.msra.mxu1 %v283_v29 }
  0x24   :  { %606 = vmatprep.subr.mxu1 %v724_v1 }
  0x25   :  { %121 = vperm.xlu0 %672, %v74_v17   ;;  %118 = vperm.xlu1 %673, %v73_v18   ;;  %v675_v25 = vpop.eup %674 }
  0x26   :  { %607 = vmatpush3.msra.mxu1 %v282_v30 }
  0x27   :  { %608 = vmatprep.subr.mxu1 %v724_v1 }
  0x28   :  { %609 = vmatpush3.msra.mxu1 %v281_v31 }
  0x29   :  { %115 = vperm.xlu0 %672, %v72_v19   ;;  %112 = vperm.xlu1 %673, %v71_v20   ;;  %v506_v19 = vld [vmem:[%s969_s5] ss:$0 sm:$0xff] }
  0x2a   :  { %610 = vmatprep.subr.mxu1 %v724_v1 }
  0x2b   :  { %611 = vmatpush3.msra.mxu1 %v280_v32 }
  0x2c   :  { %612 = vmatprep.subr.mxu1 %v724_v1 }
  0x2d   :  { %109 = vperm.xlu0 %672, %v70_v21   ;;  %47 = vperm.xlu1 %673, %v42_v6   ;;  %v373_v6 = vld [vmem:[#allocation4 + $0x40] sm:$0xff] }
  0x2e   :  { %613 = vmatpush3.msra.mxu1 %v279_v33 }
  0x2f   :  { %614 = vmatprep.subr.mxu1 %v724_v1 }
  0x30   :  { %615 = vmatpush3.msra.mxu1 %v278_v34 }
  0x31   :  { %51 = vperm.xlu0 %672, %v43_v7   ;;  %106 = vperm.xlu1 %673, %v69_v22   ;;  %v372_v7 = vld [vmem:[#allocation4 + $0x38] sm:$0xff] }
  0x32   :  { %616 = vmatprep.subr.mxu1 %v724_v1 }
  0x33   :  { %617 = vmatpush3.msra.mxu1 %v277_v35 }
  0x34   :  { %618 = vmatprep.subr.mxu1 %v724_v1 }
  0x35   :  { %63 = vperm.xlu0 %672, %v675_v25   ;;  %619 = vmatpush3.msra.mxu1 %v276_v36 }
  0x36   :  { %620 = vmatprep.subr.mxu1 %v724_v1 }
  0x37   :  { %621 = vmatpush3.msra.mxu1 %v275_v37 }
  0x38   :  { %622 = vmatprep.subr.mxu1 %v724_v1 }
  0x39   :  { %623 = vmatpush3.msra.mxu1 %v274_v38 }
  0x3a   :  { %624 = vmatprep.subr.mxu1 %v724_v1 }
  0x3b   :  { %625 = vmatpush3.msra.mxu1 %v273_v61 }
  0x8c   :  { %v152_v41 = vpop.permute.xlu0 %151  ;;  %v146_v42 = vpop.permute.xlu1 %145 }
  0x8d   :  { %vm168_vm2 = vcmp.eq.s32.totalorder %v886_v40, %v152_v41  ;;  %vm166_vm4 = vcmp.eq.s32.totalorder %v886_v40, %v146_v42 }
  0x8e   :  { %560 = vmatpush3.msk.msra.mxu0 %vm168_vm2, %v726_v43 }
  0x8f   :  { %561 = vmatprep.subr.mxu0 %v724_v1 }
  0x90   :  { %v149_v44 = vpop.permute.xlu0 %148  ;;  %v143_v45 = vpop.permute.xlu1 %142 }
  0x91   :  { %vm167_vm3 = vcmp.eq.s32.totalorder %v886_v40, %v149_v44  ;;  %vm165_vm5 = vcmp.eq.s32.totalorder %v886_v40, %v143_v45 }
  0x92   :  { %562 = vmatpush3.msk.msra.mxu0 %vm167_vm3, %v726_v43 }
  0x93   :  { %563 = vmatprep.subr.mxu0 %v724_v1 }
  0x94   :  { %564 = vmatpush3.msk.msra.mxu0 %vm166_vm4, %v726_v43  ;;  %v140_v46 = vpop.permute.xlu0 %139  ;;  %v137_v47 = vpop.permute.xlu1 %136 }
  0x95   :  { %565 = vmatprep.subr.mxu0 %v724_v1  ;;  %vm164_vm6 = vcmp.eq.s32.totalorder %v886_v40, %v140_v46  ;;  %vm163_vm7 = vcmp.eq.s32.totalorder %v886_v40, %v137_v47 }
  0x96   :  { %566 = vmatpush3.msk.msra.mxu0 %vm165_vm5, %v726_v43 }
  0x97   :  { %567 = vmatprep.subr.mxu0 %v724_v1 }
  0x98   :  { %568 = vmatpush3.msk.msra.mxu0 %vm164_vm6, %v726_v43  ;;  %v134_v48 = vpop.permute.xlu0 %133  ;;  %v131_v49 = vpop.permute.xlu1 %130 }
  0x99   :  { %569 = vmatprep.subr.mxu0 %v724_v1  ;;  %vm162_vm8 = vcmp.eq.s32.totalorder %v886_v40, %v134_v48  ;;  %vm161_vm9 = vcmp.eq.s32.totalorder %v886_v40, %v131_v49 }
  0x9a   :  { %570 = vmatpush3.msk.msra.mxu0 %vm163_vm7, %v726_v43 }
  0x9b   :  { %571 = vmatprep.subr.mxu0 %v724_v1 }
  0x9c   :  { %572 = vmatpush3.msk.msra.mxu0 %vm162_vm8, %v726_v43  ;;  %v128_v50 = vpop.permute.xlu0 %127  ;;  %v125_v51 = vpop.permute.xlu1 %124 }
  0x9d   :  { %573 = vmatprep.subr.mxu0 %v724_v1  ;;  %vm160_vm10 = vcmp.eq.s32.totalorder %v886_v40, %v128_v50  ;;  %vm159_vm11 = vcmp.eq.s32.totalorder %v886_v40, %v125_v51 }
  0x9e   :  { %574 = vmatpush3.msk.msra.mxu0 %vm161_vm9, %v726_v43 }
  0x9f   :  { %575 = vmatprep.subr.mxu0 %v724_v1 }
  0xa0   :  { %576 = vmatpush3.msk.msra.mxu0 %vm160_vm10, %v726_v43  ;;  %v122_v52 = vpop.permute.xlu0 %121  ;;  %v119_v53 = vpop.permute.xlu1 %118 }
  0xa1   :  { %577 = vmatprep.subr.mxu0 %v724_v1  ;;  %vm158_vm12 = vcmp.eq.s32.totalorder %v886_v40, %v122_v52  ;;  %vm157_vm13 = vcmp.eq.s32.totalorder %v886_v40, %v119_v53 }
  0xa2   :  { %578 = vmatpush3.msk.msra.mxu0 %vm159_vm11, %v726_v43 }
  0xa3   :  { %579 = vmatprep.subr.mxu0 %v724_v1 }
  0xa4   :  { %580 = vmatpush3.msk.msra.mxu0 %vm158_vm12, %v726_v43  ;;  %v116_v54 = vpop.permute.xlu0 %115  ;;  %v113_v55 = vpop.permute.xlu1 %112 }
  0xa5   :  { %581 = vmatprep.subr.mxu0 %v724_v1  ;;  %vm156_vm14 = vcmp.eq.s32.totalorder %v886_v40, %v116_v54  ;;  %vm155_vm15 = vcmp.eq.s32.totalorder %v886_v40, %v113_v55 }
  0xa6   :  { %582 = vmatpush3.msk.msra.mxu0 %vm157_vm13, %v726_v43 }
  0xa7   :  { %583 = vmatprep.subr.mxu0 %v724_v1 }
  0xa8   :  { %584 = vmatpush3.msk.msra.mxu0 %vm156_vm14, %v726_v43  ;;  %v110_v56 = vpop.permute.xlu0 %109  ;;  %v48_v57 = vpop.permute.xlu1 %47 }
  0xa9   :  { %585 = vmatprep.subr.mxu0 %v724_v1  ;;  %vm154_vm0 = vcmp.eq.s32.totalorder %v886_v40, %v110_v56  ;;  %vm49_vm4 = vcmp.ge.s32.totalorder %v886_v40, %v48_v57 }
  0xaa   :  { %586 = vmatpush3.msk.msra.mxu0 %vm155_vm15, %v726_v43 }
  0xab   :  { %587 = vmatprep.subr.mxu0 %v724_v1 }
  0xac   :  { %588 = vmatpush3.msk.msra.mxu0 %vm154_vm0, %v726_v43  ;;  %v52_v58 = vpop.permute.xlu0 %51  ;;  %v107_v59 = vpop.permute.xlu1 %106 }
  0xad   :  { %vm53_vm2 = vcmp.lt.s32.totalorder %v886_v40, %v52_v58  ;;  %vm153_vm3 = vcmp.eq.s32.totalorder %v886_v40, %v107_v59  ;;  %589 = vmatprep.subr.mxu0 %v724_v1 }
  0xae   :  { %590 = vmatpush3.msk.msra.mxu0 %vm153_vm3, %v726_v43  ;;  %vm54_vm5 = vmand %vm49_vm4, %vm53_vm2 }
  0xaf   :  { %629 = vmatprep.subr.mxu0 %v724_v1 }
  0xb0   :  { %v64_v60 = vpop.permute.xlu0 %63 }
  0xb1   :  { %592 = vmatmul.mubr.msk.f32.vlgmr.msra.gmra.mxu0 %vm54_vm5, %v64_v60 }
  0xb2   :  { %661 = vmatprep.mubr.msk.f32.mxu0 %vm725_vm1, %v724_v1  ;;  %630 = vmatpush3.msra.mxu0 %v380_v62 }
  0xb3   :  { %631 = vmatprep.subr.mxu0 %v724_v1 }
  0xb4   :  { %632 = vmatpush3.msra.mxu0 %v379_v63 }
  0xb5   :  { %633 = vmatprep.subr.mxu0 %v724_v1 }
  0xb6   :  { %634 = vmatpush3.msra.mxu0 %v378_v0 }
  0xb7   :  { %635 = vmatprep.subr.mxu0 %v724_v1 }
  0xb8   :  { %636 = vmatpush3.msra.mxu0 %v377_v2 }
  0xb9   :  { %637 = vmatprep.subr.mxu0 %v724_v1 }
  0xba   :  { %638 = vmatpush3.msra.mxu0 %v376_v3 }
  0xbb   :  { %639 = vmatprep.subr.mxu0 %v724_v1 }
  0xbc   :  { %640 = vmatpush3.msra.mxu0 %v375_v4 }
  0xbd   :  { %641 = vmatprep.subr.mxu0 %v724_v1 }
  0xbe   :  { %642 = vmatpush3.msra.mxu0 %v374_v5 }
  0xbf   :  { %643 = vmatprep.subr.mxu0 %v724_v1 }
  0xc0   :  { %644 = vmatpush3.msra.mxu0 %v373_v6 }
  0xc1   :  { %645 = vmatprep.subr.mxu0 %v724_v1 }
  0xc2   :  { %646 = vmatpush3.msra.mxu0 %v372_v7 }
  0xc3   :  { %647 = vmatprep.subr.mxu0 %v724_v1 }
  0xc4   :  { %648 = vmatpush3.msra.mxu0 %v371_v8 }
  0xc5   :  { %649 = vmatprep.subr.mxu0 %v724_v1 }
  0xc6   :  { %650 = vmatpush3.msra.mxu0 %v370_v9 }
  0xc7   :  { %651 = vmatprep.subr.mxu0 %v724_v1 }
  0xc8   :  { %652 = vmatpush3.msra.mxu0 %v369_v10 }
  0xc9   :  { %653 = vmatprep.subr.mxu0 %v724_v1 }
  0xca   :  { %654 = vmatpush3.msra.mxu0 %v368_v11 }
  0xcb   :  { %655 = vmatprep.subr.mxu0 %v724_v1 }
  0xcc   :  { %656 = vmatpush3.msra.mxu0 %v367_v12 }
  0xcd   :  { %657 = vmatprep.subr.mxu0 %v724_v1 }
  0xce   :  { %658 = vmatpush3.msra.mxu0 %v366_v13 }
  0xcf   :  { %659 = vmatprep.subr.mxu0 %v724_v1 }
  0xd0   :  { %660 = vmatpush3.msra.mxu0 %v365_v16 }
 0x171   :  { %v268_v14 = vpop.f32.mrf.mxu0 }
 0x172   :  { %627 = vmatmul.mubr.f32.vlgmr.msra.gmra.mxu1 %v268_v14 }
 0x173   :  { %v593_v15 = vpop.f32.mrf.mxu0 }
 0x232   :  { %v355_v17 = vpop.f32.mrf.mxu1 }
 0x233   :  { %662 = vmatmul.mubr.f32.vlgmr.msra.gmra.mxu0 %v355_v17 }
 0x234   :  { %v628_v18 = vpop.f32.mrf.mxu1 }
 0x2f3   :  { %v454_v20 = vpop.f32.mrf.mxu0 }
 0x2f4   :  { %v455_v21 = vadd.f32 %v506_v19, %v454_v20 }
 0x2f5   :  { %v663_v22 = vpop.f32.mrf.mxu0 }
 0x2f6   :  { %458 = vst [vmem:[#allocation7] sm:$0xff] %v455_v21 }
 0x2f7   :  { %707 = shalt.err (!%p704_p9)
}
 0x2f8   :  { %468 = dma.vmem_to_hbm [thread:$0]  %s466_s17, 128, %s970_s6, [#allocation6]  }
 0x2f9   :  { %718 = dma.done.wait [#allocation6], 128  }
 0x2fa   :  { %719 = vsyncadd [#allocation6], 4294967168 }
 0x2fb   :  { %472 = vsyncpa [#allocation5], 1 }
 0x2fc   :  { %473 = vsyncpa [#allocation6], 1 }

</bundles_post_ra>
